<compile_context>
chip_gen: v6e
topology: v6e:2x2x1
jax: 0.10.0
libtpu: 0.0.40
codegen_flags: <defaults>
</compile_context>

<pallas_src>
import numpy as np
import jax
import jax.numpy as jnp
from jax.experimental import pallas as pl
from jax.experimental.pallas import tpu as pltpu


def _get_padding(offset: int):
    """Replicates Combiner.getPadding (returns [low, high] padding)."""
    if offset % 2 == 0:
        pad = 2 * [int(np.sign(offset) * (np.abs(offset) // 2))]
    else:
        pad = [int(np.sign(offset) * (np.abs(offset) // 2)),
               int(np.sign(offset) * (np.abs(offset) // 2 + 1))]
    return pad


def _padded_block_bytes(block_shape, itemsize):
    """VMEM bytes of one block after (8,128) tiling of the last two dims."""
    s = list(block_shape)
    s[-1] = -(-s[-1] // 128) * 128
    s[-2] = -(-s[-2] // 8) * 8
    n = 1
    for d in s:
        n *= int(d)
    return n * itemsize


def _pick_batch_block(n, per_sample_bytes, budget_bytes):
    """Largest batch block (divisor of n) whose single-buffered footprint fits
    the budget.  For large samples keep >=2 grid steps (feed both v7x TCs);
    for tiny samples fold the whole batch into one step to amortize the
    ~0.35us per-step overhead."""
    divisors = [d for d in range(1, n + 1) if n % d == 0]
    fitting = [d for d in divisors if d * per_sample_bytes <= budget_bytes]
    if not fitting:
        # A single sample exceeds the budget; run one sample per step and let
        # vmem_limit_bytes grow.  (Channel tiling would be the next step for
        # very large single-sample slabs, e.g. realistic U-Nets on v7x.)
        return 1
    if per_sample_bytes >= (2 << 20):
        multi = [d for d in fitting if n // d >= 2]
        if multi:
            return max(multi)
    return max(fitting)


def _make_kernel_flat(C1, C2, pad_lo, pad_hi):
    """Lane-dense layout kernel: arrays are (N, C, H*W).  Valid only when no
    W padding is needed, so the spatial pad is a pad of the flat axis."""

    def kernel(x1_ref, x2_ref, out_ref):
        x = x1_ref[...]                               # (nb, C1, H1*W2)
        nb = x.shape[0]
        dt = out_ref.dtype
        parts = []
        if pad_lo:
            parts.append(jnp.zeros((nb, C1, pad_lo), dt))
        parts.append(x)
        if pad_hi:
            parts.append(jnp.zeros((nb, C1, pad_hi), dt))
        xp = parts[0] if len(parts) == 1 else jnp.concatenate(parts, axis=-1)
        # Single full-extent, lane-dense store of the padded decoder slab.
        out_ref[:, 0:C1, :] = xp
        # Encoder slab: straight lane-dense copy.
        out_ref[:, C1:C1 + C2, :] = x2_ref[...]

    return kernel


def _make_kernel_4d(C1, C2, H1, W2, pad_t, pad_b, pad_l, pad_r):
    """General NCHW kernel (used when W needs padding)."""

    def kernel(x1_ref, x2_ref, out_ref):
        x = x1_ref[...]                               # (nb, C1, H1, W1)
        nb = x.shape[0]
        dt = out_ref.dtype
        # Pad W (lane axis) in-registers.
        wparts = []
        if pad_l:
            wparts.append(jnp.zeros((nb, C1, H1, pad_l), dt))
        wparts.append(x)
        if pad_r:
            wparts.append(jnp.zeros((nb, C1, H1, pad_r), dt))
        x = wparts[0] if len(wparts) == 1 else jnp.concatenate(wparts, axis=-1)
        # Pad H (sublane axis) in-registers.
        hparts = []
        if pad_t:
            hparts.append(jnp.zeros((nb, C1, pad_t, W2), dt))
        hparts.append(x)
        if pad_b:
            hparts.append(jnp.zeros((nb, C1, pad_b, W2), dt))
        x = hparts[0] if len(hparts) == 1 else jnp.concatenate(hparts, axis=-2)
        # Single full-extent store of the padded decoder slab (no zero pass,
        # no masked interior store), then the encoder copy.
        out_ref[:, 0:C1, :, :] = x
        out_ref[:, C1:C1 + C2, :, :] = x2_ref[...]

    return kernel


def combiner(input1, input2, *, vmem_block_budget_bytes=12 * 1024 * 1024):
    """Pallas equivalent of Combiner.forward(input1, input2). NCHW layout."""
    N, C1, H1, W1 = input1.shape
    N2, C2, H2, W2 = input2.shape
    assert N == N2, "batch dims must match"

    pad_h = _get_padding(H2 - H1)   # [top, bottom]
    pad_w = _get_padding(W2 - W1)   # [left, right]

    # Negative padding in F.pad means cropping; handle it as glue (static
    # slicing) so the kernel only ever sees non-negative padding.
    crop_t, crop_b = max(0, -pad_h[0]), max(0, -pad_h[1])
    crop_l, crop_r = max(0, -pad_w[0]), max(0, -pad_w[1])
    if crop_t or crop_b or crop_l or crop_r:
        input1 = input1[:, :, crop_t:H1 - crop_b, crop_l:W1 - crop_r]
        _, _, H1, W1 = input1.shape

    pad_t, pad_b = max(0, pad_h[0]), max(0, pad_h[1])
    pad_l, pad_r = max(0, pad_w[0]), max(0, pad_w[1])
    assert pad_t + H1 + pad_b == H2 and pad_l + W1 + pad_r == W2

    out_dtype = jnp.result_type(input1.dtype, input2.dtype)
    input1 = input1.astype(out_dtype)
    input2 = input2.astype(out_dtype)
    Ctot = C1 + C2
    itemsize = jnp.dtype(out_dtype).itemsize

    # Lane-dense fast path: if W needs no padding, fold (H, W) -> H*W so the
    # minor dim is large instead of W2 (< 128 lanes) with masked stores.
    flat = (W1 == W2)

    if flat:
        HW1, HW2 = H1 * W2, H2 * W2
        x1 = input1.reshape(N, C1, HW1)      # free reshape on contiguous data
        x2 = input2.reshape(N, C2, HW2)
        in_shapes = [(C1, HW1), (C2, HW2)]
        out_inner = (Ctot, HW2)
        kernel = _make_kernel_flat(C1, C2, pad_t * W2, pad_b * W2)
        idx_map = lambda b: (b, 0, 0)
    else:
        x1, x2 = input1, input2
        in_shapes = [(C1, H1, W1), (C2, H2, W2)]
        out_inner = (Ctot, H2, W2)
        kernel = _make_kernel_4d(C1, C2, H1, W2, pad_t, pad_b, pad_l, pad_r)
        idx_map = lambda b: (b, 0, 0, 0)

    per_sample = sum(_padded_block_bytes((1,) + s, itemsize)
                     for s in in_shapes + [out_inner])
    nb = _pick_batch_block(N, per_sample, vmem_block_budget_bytes)
    step_bytes = nb * per_sample
    # Double-buffered pipeline + headroom for in-register temporaries.
    vmem_limit = int(min(max(2 * step_bytes + (8 << 20), 32 << 20), 128 << 20))

    out = pl.pallas_call(
        kernel,
        out_shape=jax.ShapeDtypeStruct((N,) + out_inner, out_dtype),
        grid_spec=pltpu.PrefetchScalarGridSpec(
            num_scalar_prefetch=0,
            grid=(N // nb,),
            in_specs=[pl.BlockSpec((nb,) + in_shapes[0], idx_map),
                      pl.BlockSpec((nb,) + in_shapes[1], idx_map)],
            out_specs=pl.BlockSpec((nb,) + out_inner, idx_map),
        ),
        compiler_params=pltpu.CompilerParams(
            dimension_semantics=("parallel",),
            vmem_limit_bytes=vmem_limit),
    )(x1, x2)

    return out.reshape(N, Ctot, H2, W2)


def _reference(input1, input2):
    """Pure-JAX reference mirroring the PyTorch forward."""
    N, C1, H1, W1 = input1.shape
    _, C2, H2, W2 = input2.shape
    pad_h = _get_padding(H2 - H1)
    pad_w = _get_padding(W2 - W1)
    x1 = input1
    ct, cb = max(0, -pad_h[0]), max(0, -pad_h[1])
    cl, cr = max(0, -pad_w[0]), max(0, -pad_w[1])
    x1 = x1[:, :, ct:H1 - cb, cl:W1 - cr]
    x1 = jnp.pad(x1, ((0, 0), (0, 0),
                      (max(0, pad_h[0]), max(0, pad_h[1])),
                      (max(0, pad_w[0]), max(0, pad_w[1]))))
    return jnp.concatenate([x1, input2], axis=1)


if __name__ == "__main__":
    key = jax.random.PRNGKey(0)
    k1, k2, k3 = jax.random.split(key, 3)

    # Case A: only H differs (typical U-Net case) -> lane-dense flat path.
    a1 = jax.random.normal(k1, (2, 4, 14, 16), dtype=jnp.float32)
    a2 = jax.random.normal(k2, (2, 6, 16, 16), dtype=jnp.float32)
    out_a = jax.block_until_ready(combiner(a1, a2))
    ref_a = _reference(a1, a2)
    assert out_a.shape == ref_a.shape == (2, 10, 16, 16)
    assert jnp.array_equal(out_a, ref_a)

    # Case B: H and W both differ (odd W offset -> asymmetric pad) -> 4-D path.
    b1 = jax.random.normal(k3, (2, 4, 14, 13), dtype=jnp.float32)
    out_b = jax.block_until_ready(combiner(b1, a2))
    ref_b = _reference(b1, a2)
    assert out_b.shape == ref_b.shape == (2, 10, 16, 16)
    assert jnp.array_equal(out_b, ref_b)

    print("KERNEL_OK")
</pallas_src>

<mosaic_0001>
module attributes {stable_mosaic.version = 11 : i64} {
  func.func @kernel(%arg0: i32, %arg1: memref<2x4x224xf32, #tpu.memory_space<vmem>>, %arg2: memref<2x6x256xf32, #tpu.memory_space<vmem>>, %arg3: memref<2x10x256xf32, #tpu.memory_space<vmem>>) attributes {dimension_semantics = [#tpu.dimension_semantics<parallel>], iteration_bounds = array<i64: 1>, scalar_prefetch = 0 : i64, scratch_operands = 0 : i64, tpu.core_type = #tpu.core_type<tc>, window_params = [{transform_indices = @transform_0, window_bounds = array<i64: 2, 4, 224>}, {transform_indices = @transform_1, window_bounds = array<i64: 2, 6, 256>}, {transform_indices = @transform_2, window_bounds = array<i64: 2, 10, 256>}]} {
    %c0 = arith.constant 0 : index
    %c0_0 = arith.constant 0 : index
    %c0_1 = arith.constant 0 : index
    %0 = vector.load %arg1[%c0, %c0_0, %c0_1] : memref<2x4x224xf32, #tpu.memory_space<vmem>>, vector<2x4x224xf32>
    %cst = arith.constant 0.000000e+00 : f32
    %1 = vector.broadcast %cst : f32 to vector<2x4x16xf32>
    %cst_2 = arith.constant 0.000000e+00 : f32
    %2 = vector.broadcast %cst_2 : f32 to vector<2x4x16xf32>
    %3 = tpu.concatenate %1, %0, %2 in 2 : vector<2x4x16xf32>, vector<2x4x224xf32>, vector<2x4x16xf32> -> vector<2x4x256xf32>
    %c0_3 = arith.constant 0 : index
    %c0_4 = arith.constant 0 : index
    %c0_5 = arith.constant 0 : index
    %4 = vector.load %arg3[%c0_3, %c0_4, %c0_5] : memref<2x10x256xf32, #tpu.memory_space<vmem>>, vector<2x4x256xf32>
    tpu.vector_store %arg3[%c0_3, %c0_4, %c0_5], %3 {strides = array<i32>} : memref<2x10x256xf32, #tpu.memory_space<vmem>>, vector<2x4x256xf32>,
    %c0_6 = arith.constant 0 : index
    %c0_7 = arith.constant 0 : index
    %c0_8 = arith.constant 0 : index
    %5 = vector.load %arg2[%c0_6, %c0_7, %c0_8] : memref<2x6x256xf32, #tpu.memory_space<vmem>>, vector<2x6x256xf32>
    %c0_9 = arith.constant 0 : index
    %c4 = arith.constant 4 : index
    %c0_10 = arith.constant 0 : index
    %6 = vector.load %arg3[%c0_9, %c4, %c0_10] : memref<2x10x256xf32, #tpu.memory_space<vmem>>, vector<2x6x256xf32>
    tpu.vector_store %arg3[%c0_9, %c4, %c0_10], %5 {strides = array<i32>} : memref<2x10x256xf32, #tpu.memory_space<vmem>>, vector<2x6x256xf32>,
    return
  }
  func.func @transform_0(%arg0: i32) -> (i32, i32, i32) {
    %c0_i32 = arith.constant 0 : i32
    %c0_i32_0 = arith.constant 0 : i32
    %c0_i32_1 = arith.constant 0 : i32
    return %arg0, %c0_i32, %c0_i32_0 : i32, i32, i32
  }
  func.func @transform_1(%arg0: i32) -> (i32, i32, i32) {
    %c0_i32 = arith.constant 0 : i32
    %c0_i32_0 = arith.constant 0 : i32
    %c0_i32_1 = arith.constant 0 : i32
    return %arg0, %c0_i32, %c0_i32_0 : i32, i32, i32
  }
  func.func @transform_2(%arg0: i32) -> (i32, i32, i32) {
    %c0_i32 = arith.constant 0 : i32
    %c0_i32_0 = arith.constant 0 : i32
    %c0_i32_1 = arith.constant 0 : i32
    return %arg0, %c0_i32, %c0_i32_0 : i32, i32, i32
  }
}

</mosaic_0001>

<bundles_post_ra>
// kernel: tpu_custom_call.1
= control target key start
LH: loop header
LB: loop body
LE: loop exit
PB: predicated region body
PF: predicated region fallthrough
CT: control target
= control target key end

     0   :  { %s72_s15 = smov 16   ;;  %vm25_vm0 = vcmask 130048   ;;  %vm34_vm1 = vcmask 916480   ;;  %s130_s0 = inlined_call_operand.vmem [shape: f32[2,4,224], index: 0, kind: input, shape index: {}]   ;;  %s131_s1 = inlined_call_operand.vmem [shape: f32[2,6,256], index: 1, kind: input, shape index: {}]   ;;  %s132_s2 = inlined_call_operand.vmem [shape: f32[2,10,256], index: 2, kind: output, shape index: {}]  }
   0x1   :  { %v12_v0 = vld [vmem:[%s130_s0 + $0x8] sm:$0xff]  ;;  %v11_v1 = vld [vmem:[%s130_s0] sm:$0xff]  ;;  %v43_v6 = vld [vmem:[%s131_s1 + $0x10] sm:$0x3f] }
   0x2   :  { %v41_v2 = vld [vmem:[%s131_s1] sm:$0x3f]  ;;  %21 = vrot.lane.b32.xlu1 %v12_v0, %s72_s15  ;;  %v16_v3 = vcombine.high %v12_v0, %v12_v0  ;;  %17 = vrot.lane.b32.xlu0 %v11_v1, %s72_s15  ;;  %v15_v4 = vcombine.high %v11_v1, %v11_v1  ;;  %v42_v5 = vld [vmem:[%s131_s1 + $0x8] sm:$0x3f]  ;;  %v51_v10 = vrot.slane %v43_v6, 4 }
   0x3   :  { %v49_v7 = vrot.slane %v41_v2, 4  ;;  %v44_v8 = vld [vmem:[%s131_s1 + $0x18] sm:$0x3f]  ;;  %v50_v9 = vrot.slane %v42_v5, 4 }
   0x4   :  { %v52_v11 = vrot.slane %v44_v8, 4  ;;  %61 = vst [vmem:[%s132_s2 + $0x30] ss:$-12 sps:$4 sm:$0xf3] %v51_v10  }
   0x5   :  { %57 = vst [vmem:[%s132_s2 + $0x10] ss:$-12 sps:$4 sm:$0xf3] %v49_v7   ;;  %58 = vst [vmem:[%s132_s2 + $0x18] ss:$-12 sps:$4 sm:$0xf3] %v50_v9  }
   0x6   :  { %23 = vrot.lane.b32.xlu1 %v16_v3, %s72_s15  ;;  %19 = vrot.lane.b32.xlu0 %v15_v4, %s72_s15  ;;  %62 = vst [vmem:[%s132_s2 + $0x38] ss:$-12 sps:$4 sm:$0xf3] %v52_v11  }
  0x74   :  { %v22_v12 = vpop.permute.xlu1 %21  ;;  %v18_v13 = vpop.permute.xlu0 %17 }
  0x75   :  { %v33_v14 = vsel %vm25_vm0, 0.0, %v22_v12  ;;  %v32_v15 = vsel %vm25_vm0, 0.0, %v18_v13 }
  0x76   :  { %39 = vst [vmem:[%s132_s2 + $0x20] sm:$0xf] %v33_v14  ;;  %37 = vst [vmem:[%s132_s2] sm:$0xf] %v32_v15 }
  0x78   :  { %v24_v16 = vpop.permute.xlu1 %23  ;;  %v20_v17 = vpop.permute.xlu0 %19 }
  0x79   :  { %v27_v18 = vsel %vm25_vm0, %v22_v12, %v24_v16  ;;  %v26_v19 = vsel %vm25_vm0, %v18_v13, %v20_v17 }
  0x7a   :  { %v36_v20 = vsel %vm34_vm1, %v27_v18, 0.0  ;;  %v35_v21 = vsel %vm34_vm1, %v26_v19, 0.0 }
  0x7b   :  { %40 = vst [vmem:[%s132_s2 + $0x28] sm:$0xf] %v36_v20  ;;  %38 = vst [vmem:[%s132_s2 + $0x8] sm:$0xf] %v35_v21 }

</bundles_post_ra>
